<compile_context>
chip_gen: v7x
topology: tpu7x:2x2x1
jax: 0.10.0
libtpu: 0.0.40
codegen_flags: <defaults>
</compile_context>

<pallas_src>
import functools

import jax
import jax.numpy as jnp
from jax.experimental import pallas as pl
from jax.experimental.pallas import tpu as pltpu

IN_FEATURES = 28 * 28     # 784  (multiple of 8 -> fine as a sublane dim)
HIDDEN = 100
OUT = 10

# Lane-aligned (multiple-of-128) padded feature sizes for the weight matrices.
HID_PAD = 128
OUT_PAD = 128


def _cdiv(a, b):
    return -(-a // b)


def _round_up(n, m):
    return _cdiv(n, m) * m


def mlp_kernel(x_ref, w1_ref, b1_ref, w2_ref, b2_ref, o_ref):
    # Cast x tile to bf16 in-register (VPU) — avoids a separate XLA pass.
    x = x_ref[...].astype(jnp.bfloat16)                      # (tb, 784)
    # Layer 1 on the MXU, K=784, f32 accumulation.
    h = jnp.dot(x, w1_ref[...], preferred_element_type=jnp.float32)
    # Bias + ReLU in f32 (keeps v5e happy: no bf16 elementwise on its VPU).
    h = jnp.maximum(h + b1_ref[...], 0.0)                     # (tb, 128)
    # Layer 2: bf16 operands, f32 accumulation.
    o = jnp.dot(h.astype(jnp.bfloat16), w2_ref[...],
                preferred_element_type=jnp.float32)           # (tb, 128)
    # bf16 output: only 10/128 lanes are real, so halve the writeback bytes.
    o_ref[...] = (o + b2_ref[...]).astype(o_ref.dtype)


@functools.partial(jax.jit, static_argnames=("tile_b",))
def ann_model_forward(x, w1p, b1p, w2p, b2p, *, tile_b=1024):
    """x: (B, 1, 28, 28) or (B, 784).  Params from pad_params().
    Returns (B, 10) f32 logits."""
    B = x.shape[0]
    x2d = x.reshape(B, -1).astype(jnp.float32)
    assert x2d.shape[1] == IN_FEATURES

    # Adaptive batch tiling: no batch padding (Pallas masks the partial last
    # block).  Split into >= 2 tiles when the batch is big enough so the
    # "parallel" axis can be sharded across v7x's two TensorCores.
    n_tiles = _cdiv(B, tile_b)
    if B >= 256:
        n_tiles = max(n_tiles, 2)
    tb = _round_up(_cdiv(B, n_tiles), 8)        # sublane-aligned tile
    grid = _cdiv(B, tb)

    cost = pl.CostEstimate(
        flops=2 * B * (IN_FEATURES * HID_PAD + HID_PAD * OUT_PAD),
        transcendentals=0,
        bytes_accessed=(B * IN_FEATURES * 4            # x (f32, read once)
                        + IN_FEATURES * HID_PAD * 2    # w1 (bf16)
                        + HID_PAD * OUT_PAD * 2        # w2 (bf16)
                        + (HID_PAD + OUT_PAD) * 4      # biases (f32)
                        + B * OUT_PAD * 2),            # out (bf16)
    )

    out = pl.pallas_call(
        mlp_kernel,
        out_shape=jax.ShapeDtypeStruct((B, OUT_PAD), jnp.bfloat16),
        grid_spec=pl.GridSpec(
            grid=(grid,),
            in_specs=[
                # x tile: last dim == full array dim (784), so legal unpadded.
                pl.BlockSpec((tb, IN_FEATURES), lambda i: (i, 0)),
                # Weights/biases: constant index_map -> VMEM-resident.
                pl.BlockSpec((IN_FEATURES, HID_PAD), lambda i: (0, 0)),
                pl.BlockSpec((1, HID_PAD), lambda i: (0, 0)),
                pl.BlockSpec((HID_PAD, OUT_PAD), lambda i: (0, 0)),
                pl.BlockSpec((1, OUT_PAD), lambda i: (0, 0)),
            ],
            out_specs=pl.BlockSpec((tb, OUT_PAD), lambda i: (i, 0)),
        ),
        compiler_params=pltpu.CompilerParams(
            dimension_semantics=("parallel",),
            vmem_limit_bytes=32 << 20,     # big tiles stay portable on v5e
        ),
        cost_estimate=cost,
    )(x2d, w1p, b1p, w2p, b2p)

    return out[:, :OUT].astype(jnp.float32)


def init_params(key):
    """Deterministic init mimicking nn.Linear's uniform(-1/sqrt(fan_in)).
    Weights stored as (in, out) == transpose of PyTorch's (out, in) layout."""
    k1, k2, k3, k4 = jax.random.split(key, 4)
    bound1 = 1.0 / float(IN_FEATURES ** 0.5)
    bound2 = 1.0 / float(HIDDEN ** 0.5)
    w1 = jax.random.uniform(k1, (IN_FEATURES, HIDDEN), jnp.float32, -bound1, bound1)
    b1 = jax.random.uniform(k2, (HIDDEN,), jnp.float32, -bound1, bound1)
    w2 = jax.random.uniform(k3, (HIDDEN, OUT), jnp.float32, -bound2, bound2)
    b2 = jax.random.uniform(k4, (OUT,), jnp.float32, -bound2, bound2)
    return w1, b1, w2, b2


def pad_params(w1, b1, w2, b2):
    """Zero-pad feature dims to lane multiples; weights cast to bf16 for MXU.
    Padded hidden columns produce relu(0 + 0) = 0, so they never contaminate
    the real outputs."""
    w1p = (jnp.zeros((IN_FEATURES, HID_PAD), jnp.float32)
           .at[:, :HIDDEN].set(w1).astype(jnp.bfloat16))
    b1p = jnp.zeros((1, HID_PAD), jnp.float32).at[0, :HIDDEN].set(b1)
    w2p = (jnp.zeros((HID_PAD, OUT_PAD), jnp.float32)
           .at[:HIDDEN, :OUT].set(w2).astype(jnp.bfloat16))
    b2p = jnp.zeros((1, OUT_PAD), jnp.float32).at[0, :OUT].set(b2)
    return w1p, b1p, w2p, b2p


if __name__ == "__main__":
    key = jax.random.PRNGKey(0)
    kx, kp = jax.random.split(key)

    B = 8
    x = jax.random.normal(kx, (B, 1, 28, 28), jnp.float32)
    w1, b1, w2, b2 = init_params(kp)
    w1p, b1p, w2p, b2p = pad_params(w1, b1, w2, b2)

    out = ann_model_forward(x, w1p, b1p, w2p, b2p)
    out = jax.block_until_ready(out)

    # Pure f32 reference (same math as the PyTorch forward).  Tolerance is
    # loose because the kernel runs the matmuls in bf16 with f32 accumulation
    # and stores logits in bf16.
    ref = jnp.maximum(x.reshape(B, -1) @ w1 + b1[None, :], 0.0) @ w2 + b2[None, :]
    assert out.shape == (B, OUT)
    assert jnp.allclose(out, ref, atol=3e-2, rtol=3e-2), (
        float(jnp.max(jnp.abs(out - ref))))

    print("KERNEL_OK")
</pallas_src>

<mosaic_0001>
module attributes {stable_mosaic.version = 11 : i64} {
  func.func @mlp_kernel(%arg0: i32, %arg1: memref<8x784xf32, #tpu.memory_space<vmem>>, %arg2: memref<784x128xbf16, #tpu.memory_space<vmem>>, %arg3: memref<1x128xf32, #tpu.memory_space<vmem>>, %arg4: memref<128x128xbf16, #tpu.memory_space<vmem>>, %arg5: memref<1x128xf32, #tpu.memory_space<vmem>>, %arg6: memref<8x128xbf16, #tpu.memory_space<vmem>>) attributes {dimension_semantics = [#tpu.dimension_semantics<parallel>], iteration_bounds = array<i64: 1>, scalar_prefetch = 0 : i64, scratch_operands = 0 : i64, tpu.core_type = #tpu.core_type<tc>, window_params = [{transform_indices = @transform_0, window_bounds = array<i64: 8, 784>}, {pipeline_mode = #tpu.pipeline_mode<synchronous>, transform_indices = @transform_1, window_bounds = array<i64: 784, 128>}, {pipeline_mode = #tpu.pipeline_mode<synchronous>, transform_indices = @transform_2, window_bounds = array<i64: 1, 128>}, {pipeline_mode = #tpu.pipeline_mode<synchronous>, transform_indices = @transform_3, window_bounds = array<i64: 128, 128>}, {pipeline_mode = #tpu.pipeline_mode<synchronous>, transform_indices = @transform_4, window_bounds = array<i64: 1, 128>}, {transform_indices = @transform_5, window_bounds = array<i64: 8, 128>}]} {
    %c0 = arith.constant 0 : index
    %c0_0 = arith.constant 0 : index
    %0 = vector.load %arg1[%c0, %c0_0] : memref<8x784xf32, #tpu.memory_space<vmem>>, vector<8x784xf32>
    %1 = arith.truncf %0 : vector<8x784xf32> to vector<8x784xbf16>
    %c0_1 = arith.constant 0 : index
    %c0_2 = arith.constant 0 : index
    %2 = vector.load %arg2[%c0_1, %c0_2] : memref<784x128xbf16, #tpu.memory_space<vmem>>, vector<784x128xbf16>
    %cst = arith.constant dense<0.000000e+00> : vector<8x128xf32>
    %3 = tpu.matmul %1, %2, %cst {dimension_numbers = #tpu.dot_dimension_numbers<[1], [0], [0], [1], [0, 0, 1, 1], [], []>} : vector<8x784xbf16>, vector<784x128xbf16>, vector<8x128xf32> -> vector<8x128xf32>
    %c0_3 = arith.constant 0 : index
    %c0_4 = arith.constant 0 : index
    %4 = vector.load %arg3[%c0_3, %c0_4] : memref<1x128xf32, #tpu.memory_space<vmem>>, vector<1x128xf32>
    %5 = vector.broadcast %4 : vector<1x128xf32> to vector<8x128xf32>
    %6 = arith.addf %3, %5 : vector<8x128xf32>
    %cst_5 = arith.constant 0.000000e+00 : f32
    %7 = vector.broadcast %cst_5 : f32 to vector<8x128xf32>
    %8 = arith.maximumf %6, %7 : vector<8x128xf32>
    %9 = arith.truncf %8 : vector<8x128xf32> to vector<8x128xbf16>
    %c0_6 = arith.constant 0 : index
    %c0_7 = arith.constant 0 : index
    %10 = vector.load %arg4[%c0_6, %c0_7] : memref<128x128xbf16, #tpu.memory_space<vmem>>, vector<128x128xbf16>
    %cst_8 = arith.constant dense<0.000000e+00> : vector<8x128xf32>
    %11 = tpu.matmul %9, %10, %cst_8 {dimension_numbers = #tpu.dot_dimension_numbers<[1], [0], [0], [1], [0, 0, 1, 1], [], []>} : vector<8x128xbf16>, vector<128x128xbf16>, vector<8x128xf32> -> vector<8x128xf32>
    %c0_9 = arith.constant 0 : index
    %c0_10 = arith.constant 0 : index
    %12 = vector.load %arg5[%c0_9, %c0_10] : memref<1x128xf32, #tpu.memory_space<vmem>>, vector<1x128xf32>
    %13 = vector.broadcast %12 : vector<1x128xf32> to vector<8x128xf32>
    %14 = arith.addf %11, %13 : vector<8x128xf32>
    %15 = arith.truncf %14 : vector<8x128xf32> to vector<8x128xbf16>
    %c0_11 = arith.constant 0 : index
    %c0_12 = arith.constant 0 : index
    %16 = vector.load %arg6[%c0_11, %c0_12] : memref<8x128xbf16, #tpu.memory_space<vmem>>, vector<8x128xbf16>
    tpu.vector_store %arg6[%c0_11, %c0_12], %15 {strides = array<i32>} : memref<8x128xbf16, #tpu.memory_space<vmem>>, vector<8x128xbf16>,
    return
  }
  func.func @transform_0(%arg0: i32) -> (i32, i32) {
    %c0_i32 = arith.constant 0 : i32
    %c0_i32_0 = arith.constant 0 : i32
    return %arg0, %c0_i32 : i32, i32
  }
  func.func @transform_1(%arg0: i32) -> (i32, i32) {
    %c0_i32 = arith.constant 0 : i32
    %c0_i32_0 = arith.constant 0 : i32
    %c0_i32_1 = arith.constant 0 : i32
    return %c0_i32, %c0_i32_0 : i32, i32
  }
  func.func @transform_2(%arg0: i32) -> (i32, i32) {
    %c0_i32 = arith.constant 0 : i32
    %c0_i32_0 = arith.constant 0 : i32
    %c0_i32_1 = arith.constant 0 : i32
    return %c0_i32, %c0_i32_0 : i32, i32
  }
  func.func @transform_3(%arg0: i32) -> (i32, i32) {
    %c0_i32 = arith.constant 0 : i32
    %c0_i32_0 = arith.constant 0 : i32
    %c0_i32_1 = arith.constant 0 : i32
    return %c0_i32, %c0_i32_0 : i32, i32
  }
  func.func @transform_4(%arg0: i32) -> (i32, i32) {
    %c0_i32 = arith.constant 0 : i32
    %c0_i32_0 = arith.constant 0 : i32
    %c0_i32_1 = arith.constant 0 : i32
    return %c0_i32, %c0_i32_0 : i32, i32
  }
  func.func @transform_5(%arg0: i32) -> (i32, i32) {
    %c0_i32 = arith.constant 0 : i32
    %c0_i32_0 = arith.constant 0 : i32
    return %arg0, %c0_i32 : i32, i32
  }
}

</mosaic_0001>

<bundles_post_ra>
// kernel: ann_model_forward.1
= control target key start
LH: loop header
LB: loop body
LE: loop exit
PB: predicated region body
PF: predicated region fallthrough
CT: control target
= control target key end

     0   :  { %v939_v44 = vmov 0.0   ;;  %vm940_vm0 = vmmov 0   ;;  %vm434_vm1 = vcmask 130048   ;;  %s1185_s1 = inlined_call_operand.vmem [shape: bf16[784,128], index: 1, kind: input, shape index: {}]   ;;  %s1186_s0 = inlined_call_operand.vmem [shape: f32[8,784], index: 0, kind: input, shape index: {}]   ;;  %s1187_s3 = inlined_call_operand.vmem [shape: bf16[128,128], index: 3, kind: input, shape index: {}]   ;;  %s1188_s2 = inlined_call_operand.vmem [shape: f32[1,128], index: 2, kind: input, shape index: {}]   ;;  %s1189_s4 = inlined_call_operand.vmem [shape: f32[1,128], index: 4, kind: input, shape index: {}]   ;;  %s1190_s5 = inlined_call_operand.vmem [shape: bf16[8,128], index: 5, kind: output, shape index: {}]  }
   0x1   :  { %v882_v0 = vld [vmem:[%s1185_s1 + $0x40] sm:$0xff]   ;;  %v886_v4 = vld [vmem:[%s1185_s1 + $0x48] sm:$0xff]   ;;  %v890_v8 = vld [vmem:[%s1185_s1 + $0x50] sm:$0xff]  }
   0x2   :  { %v883_v1 = vld [vmem:[%s1185_s1] sm:$0xff]   ;;  %777 = vmatprep.subr.bf16.mxu0 %v882_v0  ;;  %v887_v5 = vld [vmem:[%s1185_s1 + $0x8] sm:$0xff]   ;;  %v891_v9 = vld [vmem:[%s1185_s1 + $0x10] sm:$0xff]  }
   0x3   :  { %v884_v2 = vld [vmem:[%s1185_s1 + $0xc0] sm:$0xff]   ;;  %778 = vmatpush3.bf16.msra.mxu0 %v883_v1  ;;  %v888_v6 = vld [vmem:[%s1185_s1 + $0xc8] sm:$0xff]   ;;  %v892_v10 = vld [vmem:[%s1185_s1 + $0xd0] sm:$0xff]  }
   0x4   :  { %v885_v3 = vld [vmem:[%s1185_s1 + $0x80] sm:$0xff]   ;;  %799 = vmatprep.subr.bf16.mxu1 %v884_v2  ;;  %779 = vmatprep.subr.bf16.mxu0 %v886_v4  ;;  %v889_v7 = vld [vmem:[%s1185_s1 + $0x88] sm:$0xff]   ;;  %v893_v11 = vld [vmem:[%s1185_s1 + $0x90] sm:$0xff]  }
   0x5   :  { %800 = vmatpush3.bf16.msra.mxu1 %v885_v3  ;;  %v894_v12 = vld [vmem:[%s1185_s1 + $0x58] sm:$0xff]   ;;  %v898_v16 = vld [vmem:[%s1185_s1 + $0x60] sm:$0xff]   ;;  %v902_v20 = vld [vmem:[%s1185_s1 + $0x68] sm:$0xff]  }
   0x6   :  { %801 = vmatprep.subr.bf16.mxu1 %v888_v6  ;;  %v895_v13 = vld [vmem:[%s1185_s1 + $0x18] sm:$0xff]   ;;  %v899_v17 = vld [vmem:[%s1185_s1 + $0x20] sm:$0xff]   ;;  %v903_v21 = vld [vmem:[%s1185_s1 + $0x28] sm:$0xff]  }
   0x7   :  { %780 = vmatpush3.bf16.msra.mxu0 %v887_v5  ;;  %v896_v14 = vld [vmem:[%s1185_s1 + $0xd8] sm:$0xff]   ;;  %v900_v18 = vld [vmem:[%s1185_s1 + $0xe0] sm:$0xff]   ;;  %v904_v22 = vld [vmem:[%s1185_s1 + $0xe8] sm:$0xff]  }
   0x8   :  { %781 = vmatprep.subr.bf16.mxu0 %v890_v8  ;;  %v897_v15 = vld [vmem:[%s1185_s1 + $0x98] sm:$0xff]   ;;  %v901_v19 = vld [vmem:[%s1185_s1 + $0xa0] sm:$0xff]   ;;  %v905_v23 = vld [vmem:[%s1185_s1 + $0xa8] sm:$0xff]  }
   0x9   :  { %802 = vmatpush3.bf16.msra.mxu1 %v889_v7  ;;  %v906_v24 = vld [vmem:[%s1185_s1 + $0x70] sm:$0xff]   ;;  %v910_v28 = vld [vmem:[%s1185_s1 + $0x78] sm:$0xff]   ;;  %v22_v31 = vld [vmem:[%s1186_s0 + $0x8] sm:$0xff] }
   0xa   :  { %803 = vmatprep.subr.bf16.mxu1 %v892_v10  ;;  %v907_v25 = vld [vmem:[%s1185_s1 + $0x30] sm:$0xff]   ;;  %v911_v29 = vld [vmem:[%s1185_s1 + $0x38] sm:$0xff]   ;;  %v29_v32 = vpack.c.bf16 %v22_v31, %v22_v31  ;;  %v21_v34 = vld [vmem:[%s1186_s0] sm:$0xff] }
   0xb   :  { %782 = vmatpush3.bf16.msra.mxu0 %v891_v9  ;;  %v908_v26 = vld [vmem:[%s1185_s1 + $0xf0] sm:$0xff]   ;;  %v912_v30 = vld [vmem:[%s1185_s1 + $0xf8] sm:$0xff]   ;;  %v28_v35 = vpack.c.bf16 %v21_v34, %v21_v34  ;;  %v914_v36 = vld [vmem:[%s1185_s1 + $0x140] sm:$0xff]  }
   0xc   :  { %783 = vmatprep.subr.bf16.mxu0 %v894_v12  ;;  %v909_v27 = vld [vmem:[%s1185_s1 + $0xb0] sm:$0xff]   ;;  %v913_v33 = vld [vmem:[%s1185_s1 + $0xb8] sm:$0xff]   ;;  %470 = vmatprep.mubr.bf16.mxu0 %v29_v32  ;;  %v915_v39 = vld [vmem:[%s1185_s1 + $0x100] sm:$0xff]  }
   0xd   :  { %804 = vmatpush3.bf16.msra.mxu1 %v893_v11  ;;  %v24_v37 = vld [vmem:[%s1186_s0 + $0x18] sm:$0xff]  ;;  %v23_v40 = vld [vmem:[%s1186_s0 + $0x10] sm:$0xff]  ;;  %v916_v42 = vld [vmem:[%s1185_s1 + $0x148] sm:$0xff]  }
   0xe   :  { %805 = vmatprep.subr.bf16.mxu1 %v896_v14  ;;  %v31_v38 = vpack.c.bf16 %v24_v37, %v24_v37  ;;  %v30_v41 = vpack.c.bf16 %v23_v40, %v23_v40  ;;  %v917_v43 = vld [vmem:[%s1185_s1 + $0x108] sm:$0xff]   ;;  %v918_v45 = vld [vmem:[%s1185_s1 + $0x150] sm:$0xff]   ;;  %v920_v47 = vld [vmem:[%s1185_s1 + $0x158] sm:$0xff]  }
   0xf   :  { %784 = vmatpush3.bf16.msra.mxu0 %v895_v13  ;;  %v919_v46 = vld [vmem:[%s1185_s1 + $0x110] sm:$0xff]   ;;  %v921_v48 = vld [vmem:[%s1185_s1 + $0x118] sm:$0xff]   ;;  %v922_v49 = vld [vmem:[%s1185_s1 + $0x160] sm:$0xff]  }
  0x10   :  { %785 = vmatprep.subr.bf16.mxu0 %v898_v16  ;;  %510 = vmatprep.mubr.bf16.mxu1 %v31_v38  ;;  %v923_v50 = vld [vmem:[%s1185_s1 + $0x120] sm:$0xff]   ;;  %v924_v51 = vld [vmem:[%s1185_s1 + $0x168] sm:$0xff]   ;;  %v27_v55 = vld [vmem:[%s1186_s0 + $0x30] sm:$0xff] }
  0x11   :  { %806 = vmatpush3.bf16.msra.mxu1 %v897_v15  ;;  %v930_v52 = vld [vmem:[%s1185_s1 + $0x180] sm:$0xff]   ;;  %v26_v53 = vld [vmem:[%s1186_s0 + $0x28] sm:$0xff]  ;;  %v34_v57 = vpack.c.bf16 %v27_v55, %v27_v55  ;;  %v926_v58 = vld [vmem:[%s1185_s1 + $0x170] sm:$0xff]  }
  0x12   :  { %807 = vmatprep.subr.bf16.mxu1 %v900_v18  ;;  %v33_v54 = vpack.c.bf16 %v26_v53, %v26_v53  ;;  %v925_v56 = vld [vmem:[%s1185_s1 + $0x128] sm:$0xff]   ;;  %v927_v59 = vld [vmem:[%s1185_s1 + $0x130] sm:$0xff]   ;;  %v928_v60 = vld [vmem:[%s1185_s1 + $0x178] sm:$0xff]  }
  0x13   :  { %786 = vmatpush3.bf16.msra.mxu0 %v899_v17  ;;  %v929_v61 = vld [vmem:[%s1185_s1 + $0x138] sm:$0xff]   ;;  %v25_v62 = vld [vmem:[%s1186_s0 + $0x20] sm:$0xff]  ;;  %v932_v1 = vld [vmem:[%s1187_s3 + $0x8] sm:$0xff]  }
  0x14   :  { %787 = vmatprep.subr.bf16.mxu0 %v902_v20  ;;  %v32_v63 = vpack.c.bf16 %v25_v62, %v25_v62  ;;  %v931_v0 = vld [vmem:[%s1187_s3] sm:$0xff]   ;;  %v933_v2 = vld [vmem:[%s1187_s3 + $0x10] sm:$0xff]   ;;  %v934_v3 = vld [vmem:[%s1187_s3 + $0x18] sm:$0xff]  }
  0x15   :  { %808 = vmatpush3.bf16.msra.mxu1 %v901_v19  ;;  %v935_v4 = vld [vmem:[%s1187_s3 + $0x20] sm:$0xff]   ;;  %v936_v5 = vld [vmem:[%s1187_s3 + $0x28] sm:$0xff]   ;;  %v937_v6 = vld [vmem:[%s1187_s3 + $0x30] sm:$0xff]  }
  0x16   :  { %809 = vmatprep.subr.bf16.mxu1 %v904_v22  ;;  %v938_v7 = vld [vmem:[%s1187_s3 + $0x38] sm:$0xff]   ;;  %v717_v9 = vld [vmem:[%s1188_s2] ss:$0 sm:$0xff] }
  0x17   :  { %788 = vmatpush3.bf16.msra.mxu0 %v903_v21  ;;  %v768_v34 = vld [vmem:[%s1189_s4] ss:$0 sm:$0xff] }
  0x18   :  { %789 = vmatprep.subr.bf16.mxu0 %v906_v24 }
  0x19   :  { %810 = vmatpush3.bf16.msra.mxu1 %v905_v23 }
  0x1a   :  { %811 = vmatprep.subr.bf16.mxu1 %v908_v26 }
  0x1b   :  { %790 = vmatpush3.bf16.msra.mxu0 %v907_v25 }
  0x1c   :  { %791 = vmatprep.subr.bf16.mxu0 %v910_v28 }
  0x1d   :  { %812 = vmatpush3.bf16.msra.mxu1 %v909_v27 }
  0x1e   :  { %813 = vmatprep.subr.bf16.mxu1 %v912_v30 }
  0x1f   :  { %792 = vmatpush3.bf16.msra.mxu0 %v911_v29 }
  0x20   :  { %821 = vmatprep.subr.bf16.mxu0 %v914_v36 }
  0x21   :  { %814 = vmatpush3.bf16.msra.mxu1 %v913_v33 }
  0x22   :  { %471 = vmatmul.mubr.bf16.vlgmr.msra.gmra.mrb[0].mxu0 %v28_v35  ;;  %854 = vmatprep.subr.bf16.mxu1 %v939_v44 }
  0x23   :  { %822 = vmatpush3.bf16.msra.mxu0 %v915_v39  ;;  %550 = vmatprep.mubr.bf16.mxu0 %v33_v54 }
  0x24   :  { %511 = vmatmul.mubr.bf16.vlgmr.msra.gmra.mrb[0].mxu1 %v30_v41  ;;  %823 = vmatprep.subr.bf16.mxu0 %v916_v42 }
  0x25   :  { %856 = vmatprep.mubr.msk.bf16.mxu1 %vm940_vm0, %v939_v44  ;;  %855 = vmatpush3.bf16.msra.mxu1 %v930_v52 }
  0x26   :  { %860 = vmatprep.subr.bf16.mxu1 %v939_v44 }
  0x27   :  { %824 = vmatpush3.bf16.msra.mxu0 %v917_v43 }
  0x28   :  { %825 = vmatprep.subr.bf16.mxu0 %v918_v45 }
  0x2b   :  { %826 = vmatpush3.bf16.msra.mxu0 %v919_v46 }
  0x2c   :  { %827 = vmatprep.subr.bf16.mxu0 %v920_v47  ;;  %857 = vmatmul.mubr.msk.bf16.vlgmr.msra.gmra.mrb[4].mxu1 %vm434_vm1, %v34_v57 }
  0x2d   :  { %876 = vmatprep.mubr.msk.bf16.mxu1 %vm940_vm0, %v939_v44  ;;  %861 = vmatpush3.bf16.msra.mxu1 %v931_v0 }
  0x2e   :  { %862 = vmatprep.subr.bf16.mxu1 %v939_v44 }
  0x2f   :  { %828 = vmatpush3.bf16.msra.mxu0 %v921_v48 }
  0x30   :  { %829 = vmatprep.subr.bf16.mxu0 %v922_v49 }
  0x31   :  { %863 = vmatpush3.bf16.msra.mxu1 %v932_v1 }
  0x32   :  { %864 = vmatprep.subr.bf16.mxu1 %v939_v44 }
  0x33   :  { %830 = vmatpush3.bf16.msra.mxu0 %v923_v50 }
  0x34   :  { %831 = vmatprep.subr.bf16.mxu0 %v924_v51 }
  0x35   :  { %865 = vmatpush3.bf16.msra.mxu1 %v933_v2 }
  0x36   :  { %866 = vmatprep.subr.bf16.mxu1 %v939_v44 }
  0x37   :  { %832 = vmatpush3.bf16.msra.mxu0 %v925_v56 }
  0x38   :  { %833 = vmatprep.subr.bf16.mxu0 %v926_v58 }
  0x39   :  { %867 = vmatpush3.bf16.msra.mxu1 %v934_v3 }
  0x3a   :  { %868 = vmatprep.subr.bf16.mxu1 %v939_v44 }
  0x3b   :  { %834 = vmatpush3.bf16.msra.mxu0 %v927_v59 }
  0x3c   :  { %835 = vmatprep.subr.bf16.mxu0 %v928_v60 }
  0x3d   :  { %869 = vmatpush3.bf16.msra.mxu1 %v935_v4 }
  0x3e   :  { %870 = vmatprep.subr.bf16.mxu1 %v939_v44 }
  0x3f   :  { %836 = vmatpush3.bf16.msra.mxu0 %v929_v61 }
  0x41   :  { %871 = vmatpush3.bf16.msra.mxu1 %v936_v5 }
  0x42   :  { %551 = vmatmul.mubr.bf16.vlgmr.msra.gmra.mrb[4].mxu0 %v32_v63  ;;  %872 = vmatprep.subr.bf16.mxu1 %v939_v44 }
  0x45   :  { %873 = vmatpush3.bf16.msra.mxu1 %v937_v6 }
  0x46   :  { %874 = vmatprep.subr.bf16.mxu1 %v939_v44 }
  0x49   :  { %875 = vmatpush3.bf16.msra.mxu1 %v938_v7 }
  0xf5   :  { %v793_v8 = vpop.f32.mrb[0].mxu0 }
  0xf6   :  { %v794_v10 = vpop.f32.mrb[1].mxu0 }
  0xf7   :  { %v795_v11 = vadd.f32 %v794_v10, %v793_v8  ;;  %v796_v12 = vpop.f32.mrb[2].mxu0  ;;  %v815_v13 = vpop.f32.mrb[0].mxu1 }
  0xf8   :  { %v797_v14 = vpop.f32.mrb[3].mxu0  ;;  %v816_v16 = vpop.f32.mrb[1].mxu1 }
  0xf9   :  { %v473_v15 = vadd.f32 %v795_v11, %v717_v9  ;;  %v817_v17 = vadd.f32 %v816_v16, %v815_v13  ;;  %v818_v18 = vpop.f32.mrb[2].mxu1 }
  0xfa   :  { %v819_v19 = vpop.f32.mrb[3].mxu1 }
  0xfb   :  { %v513_v20 = vadd.f32 %v817_v17, %v473_v15 }
  0xff   :  { %v592_v21 = vpop.f32.mrb[4].mxu1 }
 0x100   :  { %v858_v22 = vpop.f32.mrb[5].mxu1 }
 0x101   :  { %v595_v23 = vpop.f32.mrb[6].mxu1 }
 0x102   :  { %v859_v24 = vpop.f32.mrb[7].mxu1 }
 0x115   :  { %v837_v25 = vpop.f32.mrb[4].mxu0 }
 0x116   :  { %v838_v26 = vpop.f32.mrb[5].mxu0 }
 0x117   :  { %v839_v27 = vadd.f32 %v838_v26, %v837_v25  ;;  %v840_v28 = vpop.f32.mrb[6].mxu0 }
 0x118   :  { %v841_v29 = vpop.f32.mrb[7].mxu0 }
 0x119   :  { %v553_v30 = vadd.f32 %v839_v27, %v513_v20 }
 0x11b   :  { %v593_v31 = vadd.f32 %v592_v21, %v553_v30 }
 0x11d   :  { %v598_v32 = vmax.f32 %v593_v31, 0.0 }
 0x11f   :  { %v599_v33 = vpack.c.bf16 %v598_v32, %v598_v32 }
 0x121   :  { %877 = vmatmul.mubr.bf16.vlgmr.msra.gmra.mrb[8].mxu1 %v599_v33 }
 0x1f4   :  { %v705_v35 = vpop.f32.mrb[8].mxu1 }
 0x1f5   :  { %v706_v36 = vadd.f32 %v768_v34, %v705_v35  ;;  %v878_v37 = vpop.f32.mrb[9].mxu1 }
 0x1f6   :  { %v708_v38 = vpop.f32.mrb[10].mxu1 }
 0x1f7   :  { %v711_v39 = vpack.c.bf16 %v706_v36, %v706_v36  ;;  %v879_v40 = vpop.f32.mrb[11].mxu1 }
 0x1f9   :  { %712 = vst [vmem:[%s1190_s5] sm:$0xf] %v711_v39 }

</bundles_post_ra>
